<compile_context>
chip_gen: v6e
topology: v6e:2x2x1
jax: 0.10.0
libtpu: 0.0.40
codegen_flags: <defaults>
</compile_context>

<pallas_src>
import functools
import numpy as np
import jax
import jax.numpy as jnp
from jax.experimental import pallas as pl
from jax.experimental.pallas import tpu as pltpu

EPS = 1e-5

# Conv-matmul operand dtype. f32 preserves the 1e-4 fidelity check against the f32
# reference; switch to jnp.bfloat16 on v6e/v7x (see TODO above).
DOT_DTYPE = jnp.float32


def _block_kernel(x_ref, w1_ref, w2_ref, g1_ref, b1_ref, g2_ref, b2_ref, comb_ref,
                  o_ref, *, N, C, H, W):
    """Whole residual block in one kernel, (N*C, H*W) sublane/lane-dense layout.

    x_ref    : (N*C, H*W)     f32  activations (rows ordered n*C + c, lanes h*W + w)
    w*_ref   : (N*C, 9*N*C)   f32  block-diagonal im2col conv weights
    g*,b*    : (N*C, 1)       f32  batchnorm affine params (per-channel, tiled over n)
    comb_ref : (2*N*C, 2*N*C) f32  0/1 matrix summing per-(n,c) stats over the batch dim
    o_ref    : (N*C, H*W)     f32  output
    """
    NC, HW = x_ref.shape
    inv_cnt = 1.0 / (N * H * W)

    # ---- 3x3 SAME-conv border masks from a single lane iota (hoisted, reused) -------
    lane = jax.lax.broadcasted_iota(jnp.int32, (NC, HW), 1).astype(jnp.float32)
    row = jnp.floor(lane / float(W))                    # exact at these magnitudes
    col = lane - row * float(W)
    valid = {}
    for dy in range(3):
        for dx in range(3):
            if (dy, dx) == (1, 1):
                continue                                 # center tap: mask is all-ones
            r = row + float(dy - 1)
            c = col + float(dx - 1)
            valid[(dy, dx)] = ((r >= 0.0) & (r <= float(H - 1)) &
                               (c >= 0.0) & (c <= float(W - 1)))

    def conv3x3(x_cm, w_ref):
        # im2col: 9 lane-rolled (XLU), border-masked (VPU) copies of the slab, kept as a
        # value (no VMEM scratch round trip) and fed to one fused MXU matmul, K = 9*N*C.
        taps = []
        for dy in range(3):
            for dx in range(3):
                s = (dy - 1) * W + (dx - 1)              # flat source offset
                if s == 0:
                    taps.append(x_cm)                    # center tap: no roll, no mask
                else:
                    shifted = pltpu.roll(x_cm, (-s) % HW, 1)
                    taps.append(jnp.where(valid[(dy, dx)], shifted, 0.0))
        col_slab = jnp.concatenate(taps, axis=0)         # (9*N*C, H*W), stays in vregs
        return jnp.dot(w_ref[...].astype(DOT_DTYPE), col_slab.astype(DOT_DTYPE),
                       preferred_element_type=jnp.float32)

    def bnorm(y, g_ref, b_ref):
        # Training-mode BatchNorm2d: biased per-channel batch stats, single pass.
        # The batch combine runs on the MXU (comb @ [y; y*y]); one lane reduction covers
        # both sum and sum-of-squares (one XLU tree instead of two).
        stacked = jnp.concatenate([y, y * y], axis=0)                      # (2NC, HW)
        combined = jnp.dot(comb_ref[...], stacked,
                           preferred_element_type=jnp.float32)             # (2NC, HW)
        tots = jnp.sum(combined, axis=1, keepdims=True)                    # (2NC, 1)
        t1, t2 = tots[:NC], tots[NC:]          # per-channel totals, replicated over n
        mean = t1 * inv_cnt                                                # (NC, 1)
        var = t2 * inv_cnt - mean * mean                                   # biased var
        scale = jax.lax.rsqrt(var + EPS) * g_ref[...]
        shift = b_ref[...] - mean * scale
        return y * scale + shift

    x = x_ref[...].astype(jnp.float32)
    h = jnp.maximum(bnorm(conv3x3(x, w1_ref), g1_ref, b1_ref), 0.0)        # conv1+bn1+relu
    h = bnorm(conv3x3(h, w2_ref), g2_ref, b2_ref)                          # conv2+bn2
    o_ref[...] = jnp.maximum(h + x, 0.0).astype(o_ref.dtype)               # +residual, relu


def inv_basic_block_bilinear(x_nchw, w1_hwio, w2_hwio, g1, b1, g2, b2):
    """x: (N, C, H, W) f32, conv weights HWIO (3, 3, Cin, Cout). Returns NCHW."""
    N, C, H, W = x_nchw.shape
    NC, HW = N * C, H * W

    # Host-side layout plumbing: NCHW already flattens to the (N*C, H*W) slab.
    x_cm = x_nchw.reshape(NC, HW)

    def to_mat(w_hwio):
        # (kh, kw, I, O) -> per-channel (O, 9, I) block, block-diagonal over batch, so
        # the whole conv is a single (N*C, 9*N*C) x (9*N*C, H*W) matmul.
        wm = jnp.transpose(w_hwio, (3, 0, 1, 2)).reshape(C, 9, C)
        blk = jnp.einsum('mn,otc->motnc', jnp.eye(N, dtype=wm.dtype), wm)
        return blk.reshape(NC, 9 * NC)

    def tile_nc(p):                 # per-channel (C,) -> per-row (N*C, 1)
        return jnp.tile(p.reshape(C, 1), (N, 1))

    # 0/1 matrix that sums per-(n, c) row stats over n (applied to the stacked [y; y^2]
    # slab on the MXU); per-channel totals come out already replicated across batch rows.
    comb = jnp.asarray(np.kron(np.eye(2, dtype=np.float32),
                               np.kron(np.ones((N, N), np.float32),
                                       np.eye(C, dtype=np.float32))))

    vmem = pl.BlockSpec(memory_space=pltpu.MemorySpace.VMEM)
    out_cm = pl.pallas_call(
        functools.partial(_block_kernel, N=N, C=C, H=H, W=W),
        out_shape=jax.ShapeDtypeStruct((NC, HW), x_cm.dtype),
        in_specs=[vmem] * 8,
        out_specs=vmem,
    )(x_cm, to_mat(w1_hwio), to_mat(w2_hwio),
      tile_nc(g1), tile_nc(b1), tile_nc(g2), tile_nc(b2), comb)

    return out_cm.reshape(N, C, H, W)


def _ref_forward(x_nhwc, w1, w2, g1, b1, g2, b2):
    """Pure-JAX reference (same math, via lax.conv) for validation. NHWC in/out."""
    def conv(x, w):
        return jax.lax.conv_general_dilated(
            x, w, (1, 1), 'SAME', dimension_numbers=('NHWC', 'HWIO', 'NHWC'))

    def bn(y, g, b):
        m = y.mean(axis=(0, 1, 2), keepdims=True)
        v = ((y - m) ** 2).mean(axis=(0, 1, 2), keepdims=True)
        return (y - m) * jax.lax.rsqrt(v + EPS) * g + b

    h = jax.nn.relu(bn(conv(x_nhwc, w1), g1, b1))
    h = bn(conv(h, w2), g2, b2)
    return jax.nn.relu(h + x_nhwc)


if __name__ == "__main__":
    # inplanes = planes = 4 (required for the residual add with upsample=None),
    # batch = 2, spatial = 16x16.
    N, C, H, W = 2, 4, 16, 16

    key = jax.random.PRNGKey(0)
    kx, k1, k2, kg1, kb1, kg2, kb2 = jax.random.split(key, 7)

    # PyTorch-style NCHW input (the wrapper handles the slab relayout).
    x_nchw = jax.random.normal(kx, (N, C, H, W), dtype=jnp.float32)
    x_nhwc = jnp.transpose(x_nchw, (0, 2, 3, 1))

    # Conv weights (HWIO, 3x3, no bias), kaiming-ish scale.
    w_scale = 1.0 / np.sqrt(C * 9)
    w1 = jax.random.normal(k1, (3, 3, C, C), dtype=jnp.float32) * w_scale
    w2 = jax.random.normal(k2, (3, 3, C, C), dtype=jnp.float32) * w_scale

    # BatchNorm affine params (non-trivial, to exercise the affine path).
    g1 = 1.0 + 0.1 * jax.random.normal(kg1, (C,), dtype=jnp.float32)
    b1 = 0.1 * jax.random.normal(kb1, (C,), dtype=jnp.float32)
    g2 = 1.0 + 0.1 * jax.random.normal(kg2, (C,), dtype=jnp.float32)
    b2 = 0.1 * jax.random.normal(kb2, (C,), dtype=jnp.float32)

    out_nchw = jax.block_until_ready(
        inv_basic_block_bilinear(x_nchw, w1, w2, g1, b1, g2, b2))

    ref_nhwc = jax.block_until_ready(_ref_forward(x_nhwc, w1, w2, g1, b1, g2, b2))
    ref_nchw = jnp.transpose(ref_nhwc, (0, 3, 1, 2))
    np.testing.assert_allclose(np.asarray(out_nchw), np.asarray(ref_nchw),
                               rtol=1e-4, atol=1e-4)

    print("KERNEL_OK")
</pallas_src>

<mosaic_0001>
module attributes {stable_mosaic.version = 11 : i64} {
  func.func @_block_kernel(%arg0: memref<8x256xf32, #tpu.memory_space<vmem>>, %arg1: memref<8x72xf32, #tpu.memory_space<vmem>>, %arg2: memref<8x72xf32, #tpu.memory_space<vmem>>, %arg3: memref<8x1xf32, #tpu.memory_space<vmem>>, %arg4: memref<8x1xf32, #tpu.memory_space<vmem>>, %arg5: memref<8x1xf32, #tpu.memory_space<vmem>>, %arg6: memref<8x1xf32, #tpu.memory_space<vmem>>, %arg7: memref<16x16xf32, #tpu.memory_space<vmem>>, %arg8: memref<8x256xf32, #tpu.memory_space<vmem>>) attributes {dimension_semantics = [], scalar_prefetch = 0 : i64, scratch_operands = 0 : i64, tpu.core_type = #tpu.core_type<tc>} {
    %0 = tpu.iota {dimensions = array<i32: 1>} : vector<8x256xi32>
    %1 = arith.sitofp %0 : vector<8x256xi32> to vector<8x256xf32>
    %cst = arith.constant 1.600000e+01 : f32
    %2 = vector.broadcast %cst : f32 to vector<8x256xf32>
    %3 = arith.divf %1, %2 : vector<8x256xf32>
    %4 = math.floor %3 : vector<8x256xf32>
    %cst_0 = arith.constant 1.600000e+01 : f32
    %5 = vector.broadcast %cst_0 : f32 to vector<8x256xf32>
    %6 = arith.mulf %4, %5 : vector<8x256xf32>
    %7 = arith.subf %1, %6 : vector<8x256xf32>
    %cst_1 = arith.constant -1.000000e+00 : f32
    %8 = vector.broadcast %cst_1 : f32 to vector<8x256xf32>
    %9 = arith.addf %4, %8 : vector<8x256xf32>
    %cst_2 = arith.constant -1.000000e+00 : f32
    %10 = vector.broadcast %cst_2 : f32 to vector<8x256xf32>
    %11 = arith.addf %7, %10 : vector<8x256xf32>
    %cst_3 = arith.constant 0.000000e+00 : f32
    %12 = vector.broadcast %cst_3 : f32 to vector<8x256xf32>
    %13 = arith.cmpf oge, %9, %12 : vector<8x256xf32>
    %cst_4 = arith.constant 1.500000e+01 : f32
    %14 = vector.broadcast %cst_4 : f32 to vector<8x256xf32>
    %15 = arith.cmpf ole, %9, %14 : vector<8x256xf32>
    %16 = arith.andi %13, %15 : vector<8x256xi1>
    %cst_5 = arith.constant 0.000000e+00 : f32
    %17 = vector.broadcast %cst_5 : f32 to vector<8x256xf32>
    %18 = arith.cmpf oge, %11, %17 : vector<8x256xf32>
    %19 = arith.andi %16, %18 : vector<8x256xi1>
    %cst_6 = arith.constant 1.500000e+01 : f32
    %20 = vector.broadcast %cst_6 : f32 to vector<8x256xf32>
    %21 = arith.cmpf ole, %11, %20 : vector<8x256xf32>
    %22 = arith.andi %19, %21 : vector<8x256xi1>
    %cst_7 = arith.constant -1.000000e+00 : f32
    %23 = vector.broadcast %cst_7 : f32 to vector<8x256xf32>
    %24 = arith.addf %4, %23 : vector<8x256xf32>
    %cst_8 = arith.constant 0.000000e+00 : f32
    %25 = vector.broadcast %cst_8 : f32 to vector<8x256xf32>
    %26 = arith.addf %7, %25 : vector<8x256xf32>
    %cst_9 = arith.constant 0.000000e+00 : f32
    %27 = vector.broadcast %cst_9 : f32 to vector<8x256xf32>
    %28 = arith.cmpf oge, %24, %27 : vector<8x256xf32>
    %cst_10 = arith.constant 1.500000e+01 : f32
    %29 = vector.broadcast %cst_10 : f32 to vector<8x256xf32>
    %30 = arith.cmpf ole, %24, %29 : vector<8x256xf32>
    %31 = arith.andi %28, %30 : vector<8x256xi1>
    %cst_11 = arith.constant 0.000000e+00 : f32
    %32 = vector.broadcast %cst_11 : f32 to vector<8x256xf32>
    %33 = arith.cmpf oge, %26, %32 : vector<8x256xf32>
    %34 = arith.andi %31, %33 : vector<8x256xi1>
    %cst_12 = arith.constant 1.500000e+01 : f32
    %35 = vector.broadcast %cst_12 : f32 to vector<8x256xf32>
    %36 = arith.cmpf ole, %26, %35 : vector<8x256xf32>
    %37 = arith.andi %34, %36 : vector<8x256xi1>
    %cst_13 = arith.constant -1.000000e+00 : f32
    %38 = vector.broadcast %cst_13 : f32 to vector<8x256xf32>
    %39 = arith.addf %4, %38 : vector<8x256xf32>
    %cst_14 = arith.constant 1.000000e+00 : f32
    %40 = vector.broadcast %cst_14 : f32 to vector<8x256xf32>
    %41 = arith.addf %7, %40 : vector<8x256xf32>
    %cst_15 = arith.constant 0.000000e+00 : f32
    %42 = vector.broadcast %cst_15 : f32 to vector<8x256xf32>
    %43 = arith.cmpf oge, %39, %42 : vector<8x256xf32>
    %cst_16 = arith.constant 1.500000e+01 : f32
    %44 = vector.broadcast %cst_16 : f32 to vector<8x256xf32>
    %45 = arith.cmpf ole, %39, %44 : vector<8x256xf32>
    %46 = arith.andi %43, %45 : vector<8x256xi1>
    %cst_17 = arith.constant 0.000000e+00 : f32
    %47 = vector.broadcast %cst_17 : f32 to vector<8x256xf32>
    %48 = arith.cmpf oge, %41, %47 : vector<8x256xf32>
    %49 = arith.andi %46, %48 : vector<8x256xi1>
    %cst_18 = arith.constant 1.500000e+01 : f32
    %50 = vector.broadcast %cst_18 : f32 to vector<8x256xf32>
    %51 = arith.cmpf ole, %41, %50 : vector<8x256xf32>
    %52 = arith.andi %49, %51 : vector<8x256xi1>
    %cst_19 = arith.constant 0.000000e+00 : f32
    %53 = vector.broadcast %cst_19 : f32 to vector<8x256xf32>
    %54 = arith.addf %4, %53 : vector<8x256xf32>
    %cst_20 = arith.constant -1.000000e+00 : f32
    %55 = vector.broadcast %cst_20 : f32 to vector<8x256xf32>
    %56 = arith.addf %7, %55 : vector<8x256xf32>
    %cst_21 = arith.constant 0.000000e+00 : f32
    %57 = vector.broadcast %cst_21 : f32 to vector<8x256xf32>
    %58 = arith.cmpf oge, %54, %57 : vector<8x256xf32>
    %cst_22 = arith.constant 1.500000e+01 : f32
    %59 = vector.broadcast %cst_22 : f32 to vector<8x256xf32>
    %60 = arith.cmpf ole, %54, %59 : vector<8x256xf32>
    %61 = arith.andi %58, %60 : vector<8x256xi1>
    %cst_23 = arith.constant 0.000000e+00 : f32
    %62 = vector.broadcast %cst_23 : f32 to vector<8x256xf32>
    %63 = arith.cmpf oge, %56, %62 : vector<8x256xf32>
    %64 = arith.andi %61, %63 : vector<8x256xi1>
    %cst_24 = arith.constant 1.500000e+01 : f32
    %65 = vector.broadcast %cst_24 : f32 to vector<8x256xf32>
    %66 = arith.cmpf ole, %56, %65 : vector<8x256xf32>
    %67 = arith.andi %64, %66 : vector<8x256xi1>
    %cst_25 = arith.constant 0.000000e+00 : f32
    %68 = vector.broadcast %cst_25 : f32 to vector<8x256xf32>
    %69 = arith.addf %4, %68 : vector<8x256xf32>
    %cst_26 = arith.constant 1.000000e+00 : f32
    %70 = vector.broadcast %cst_26 : f32 to vector<8x256xf32>
    %71 = arith.addf %7, %70 : vector<8x256xf32>
    %cst_27 = arith.constant 0.000000e+00 : f32
    %72 = vector.broadcast %cst_27 : f32 to vector<8x256xf32>
    %73 = arith.cmpf oge, %69, %72 : vector<8x256xf32>
    %cst_28 = arith.constant 1.500000e+01 : f32
    %74 = vector.broadcast %cst_28 : f32 to vector<8x256xf32>
    %75 = arith.cmpf ole, %69, %74 : vector<8x256xf32>
    %76 = arith.andi %73, %75 : vector<8x256xi1>
    %cst_29 = arith.constant 0.000000e+00 : f32
    %77 = vector.broadcast %cst_29 : f32 to vector<8x256xf32>
    %78 = arith.cmpf oge, %71, %77 : vector<8x256xf32>
    %79 = arith.andi %76, %78 : vector<8x256xi1>
    %cst_30 = arith.constant 1.500000e+01 : f32
    %80 = vector.broadcast %cst_30 : f32 to vector<8x256xf32>
    %81 = arith.cmpf ole, %71, %80 : vector<8x256xf32>
    %82 = arith.andi %79, %81 : vector<8x256xi1>
    %cst_31 = arith.constant 1.000000e+00 : f32
    %83 = vector.broadcast %cst_31 : f32 to vector<8x256xf32>
    %84 = arith.addf %4, %83 : vector<8x256xf32>
    %cst_32 = arith.constant -1.000000e+00 : f32
    %85 = vector.broadcast %cst_32 : f32 to vector<8x256xf32>
    %86 = arith.addf %7, %85 : vector<8x256xf32>
    %cst_33 = arith.constant 0.000000e+00 : f32
    %87 = vector.broadcast %cst_33 : f32 to vector<8x256xf32>
    %88 = arith.cmpf oge, %84, %87 : vector<8x256xf32>
    %cst_34 = arith.constant 1.500000e+01 : f32
    %89 = vector.broadcast %cst_34 : f32 to vector<8x256xf32>
    %90 = arith.cmpf ole, %84, %89 : vector<8x256xf32>
    %91 = arith.andi %88, %90 : vector<8x256xi1>
    %cst_35 = arith.constant 0.000000e+00 : f32
    %92 = vector.broadcast %cst_35 : f32 to vector<8x256xf32>
    %93 = arith.cmpf oge, %86, %92 : vector<8x256xf32>
    %94 = arith.andi %91, %93 : vector<8x256xi1>
    %cst_36 = arith.constant 1.500000e+01 : f32
    %95 = vector.broadcast %cst_36 : f32 to vector<8x256xf32>
    %96 = arith.cmpf ole, %86, %95 : vector<8x256xf32>
    %97 = arith.andi %94, %96 : vector<8x256xi1>
    %cst_37 = arith.constant 1.000000e+00 : f32
    %98 = vector.broadcast %cst_37 : f32 to vector<8x256xf32>
    %99 = arith.addf %4, %98 : vector<8x256xf32>
    %cst_38 = arith.constant 0.000000e+00 : f32
    %100 = vector.broadcast %cst_38 : f32 to vector<8x256xf32>
    %101 = arith.addf %7, %100 : vector<8x256xf32>
    %cst_39 = arith.constant 0.000000e+00 : f32
    %102 = vector.broadcast %cst_39 : f32 to vector<8x256xf32>
    %103 = arith.cmpf oge, %99, %102 : vector<8x256xf32>
    %cst_40 = arith.constant 1.500000e+01 : f32
    %104 = vector.broadcast %cst_40 : f32 to vector<8x256xf32>
    %105 = arith.cmpf ole, %99, %104 : vector<8x256xf32>
    %106 = arith.andi %103, %105 : vector<8x256xi1>
    %cst_41 = arith.constant 0.000000e+00 : f32
    %107 = vector.broadcast %cst_41 : f32 to vector<8x256xf32>
    %108 = arith.cmpf oge, %101, %107 : vector<8x256xf32>
    %109 = arith.andi %106, %108 : vector<8x256xi1>
    %cst_42 = arith.constant 1.500000e+01 : f32
    %110 = vector.broadcast %cst_42 : f32 to vector<8x256xf32>
    %111 = arith.cmpf ole, %101, %110 : vector<8x256xf32>
    %112 = arith.andi %109, %111 : vector<8x256xi1>
    %cst_43 = arith.constant 1.000000e+00 : f32
    %113 = vector.broadcast %cst_43 : f32 to vector<8x256xf32>
    %114 = arith.addf %4, %113 : vector<8x256xf32>
    %cst_44 = arith.constant 1.000000e+00 : f32
    %115 = vector.broadcast %cst_44 : f32 to vector<8x256xf32>
    %116 = arith.addf %7, %115 : vector<8x256xf32>
    %cst_45 = arith.constant 0.000000e+00 : f32
    %117 = vector.broadcast %cst_45 : f32 to vector<8x256xf32>
    %118 = arith.cmpf oge, %114, %117 : vector<8x256xf32>
    %cst_46 = arith.constant 1.500000e+01 : f32
    %119 = vector.broadcast %cst_46 : f32 to vector<8x256xf32>
    %120 = arith.cmpf ole, %114, %119 : vector<8x256xf32>
    %121 = arith.andi %118, %120 : vector<8x256xi1>
    %cst_47 = arith.constant 0.000000e+00 : f32
    %122 = vector.broadcast %cst_47 : f32 to vector<8x256xf32>
    %123 = arith.cmpf oge, %116, %122 : vector<8x256xf32>
    %124 = arith.andi %121, %123 : vector<8x256xi1>
    %cst_48 = arith.constant 1.500000e+01 : f32
    %125 = vector.broadcast %cst_48 : f32 to vector<8x256xf32>
    %126 = arith.cmpf ole, %116, %125 : vector<8x256xf32>
    %127 = arith.andi %124, %126 : vector<8x256xi1>
    %c0 = arith.constant 0 : index
    %c0_49 = arith.constant 0 : index
    %128 = vector.load %arg0[%c0, %c0_49] : memref<8x256xf32, #tpu.memory_space<vmem>>, vector<8x256xf32>
    %c17_i32 = arith.constant 17 : i32
    %129 = tpu.dynamic_rotate %128 by %c17_i32 dim 1 : vector<8x256xf32>, i32 -> vector<8x256xf32>
    %cst_50 = arith.constant 0.000000e+00 : f32
    %130 = vector.broadcast %cst_50 : f32 to vector<8x256xf32>
    %131 = arith.select %22, %129, %130 : vector<8x256xi1>, vector<8x256xf32>
    %c16_i32 = arith.constant 16 : i32
    %132 = tpu.dynamic_rotate %128 by %c16_i32 dim 1 : vector<8x256xf32>, i32 -> vector<8x256xf32>
    %cst_51 = arith.constant 0.000000e+00 : f32
    %133 = vector.broadcast %cst_51 : f32 to vector<8x256xf32>
    %134 = arith.select %37, %132, %133 : vector<8x256xi1>, vector<8x256xf32>
    %c15_i32 = arith.constant 15 : i32
    %135 = tpu.dynamic_rotate %128 by %c15_i32 dim 1 : vector<8x256xf32>, i32 -> vector<8x256xf32>
    %cst_52 = arith.constant 0.000000e+00 : f32
    %136 = vector.broadcast %cst_52 : f32 to vector<8x256xf32>
    %137 = arith.select %52, %135, %136 : vector<8x256xi1>, vector<8x256xf32>
    %c1_i32 = arith.constant 1 : i32
    %138 = tpu.dynamic_rotate %128 by %c1_i32 dim 1 : vector<8x256xf32>, i32 -> vector<8x256xf32>
    %cst_53 = arith.constant 0.000000e+00 : f32
    %139 = vector.broadcast %cst_53 : f32 to vector<8x256xf32>
    %140 = arith.select %67, %138, %139 : vector<8x256xi1>, vector<8x256xf32>
    %c255_i32 = arith.constant 255 : i32
    %141 = tpu.dynamic_rotate %128 by %c255_i32 dim 1 : vector<8x256xf32>, i32 -> vector<8x256xf32>
    %cst_54 = arith.constant 0.000000e+00 : f32
    %142 = vector.broadcast %cst_54 : f32 to vector<8x256xf32>
    %143 = arith.select %82, %141, %142 : vector<8x256xi1>, vector<8x256xf32>
    %c241_i32 = arith.constant 241 : i32
    %144 = tpu.dynamic_rotate %128 by %c241_i32 dim 1 : vector<8x256xf32>, i32 -> vector<8x256xf32>
    %cst_55 = arith.constant 0.000000e+00 : f32
    %145 = vector.broadcast %cst_55 : f32 to vector<8x256xf32>
    %146 = arith.select %97, %144, %145 : vector<8x256xi1>, vector<8x256xf32>
    %c240_i32 = arith.constant 240 : i32
    %147 = tpu.dynamic_rotate %128 by %c240_i32 dim 1 : vector<8x256xf32>, i32 -> vector<8x256xf32>
    %cst_56 = arith.constant 0.000000e+00 : f32
    %148 = vector.broadcast %cst_56 : f32 to vector<8x256xf32>
    %149 = arith.select %112, %147, %148 : vector<8x256xi1>, vector<8x256xf32>
    %c239_i32 = arith.constant 239 : i32
    %150 = tpu.dynamic_rotate %128 by %c239_i32 dim 1 : vector<8x256xf32>, i32 -> vector<8x256xf32>
    %cst_57 = arith.constant 0.000000e+00 : f32
    %151 = vector.broadcast %cst_57 : f32 to vector<8x256xf32>
    %152 = arith.select %127, %150, %151 : vector<8x256xi1>, vector<8x256xf32>
    %153 = tpu.concatenate %131, %134, %137, %140, %128, %143, %146, %149, %152 in 0 : vector<8x256xf32>, vector<8x256xf32>, vector<8x256xf32>, vector<8x256xf32>, vector<8x256xf32>, vector<8x256xf32>, vector<8x256xf32>, vector<8x256xf32>, vector<8x256xf32> -> vector<72x256xf32>
    %c0_58 = arith.constant 0 : index
    %c0_59 = arith.constant 0 : index
    %154 = vector.load %arg1[%c0_58, %c0_59] : memref<8x72xf32, #tpu.memory_space<vmem>>, vector<8x72xf32>
    %cst_60 = arith.constant dense<0.000000e+00> : vector<8x256xf32>
    %155 = tpu.matmul %154, %153, %cst_60 {dimension_numbers = #tpu.dot_dimension_numbers<[1], [0], [0], [1], [0, 0, 1, 1], [], []>} : vector<8x72xf32>, vector<72x256xf32>, vector<8x256xf32> -> vector<8x256xf32>
    %156 = arith.mulf %155, %155 : vector<8x256xf32>
    %157 = tpu.concatenate %155, %156 in 0 : vector<8x256xf32>, vector<8x256xf32> -> vector<16x256xf32>
    %c0_61 = arith.constant 0 : index
    %c0_62 = arith.constant 0 : index
    %158 = vector.load %arg7[%c0_61, %c0_62] : memref<16x16xf32, #tpu.memory_space<vmem>>, vector<16x16xf32>
    %cst_63 = arith.constant dense<0.000000e+00> : vector<16x256xf32>
    %159 = tpu.matmul %158, %157, %cst_63 {dimension_numbers = #tpu.dot_dimension_numbers<[1], [0], [0], [1], [0, 0, 1, 1], [], []>} : vector<16x16xf32>, vector<16x256xf32>, vector<16x256xf32> -> vector<16x256xf32>
    %cst_64 = arith.constant dense<0.000000e+00> : vector<16xf32>
    %160 = vector.multi_reduction <add>, %159, %cst_64 [1] : vector<16x256xf32> to vector<16xf32>
    %161 = vector.shape_cast %160 : vector<16xf32> to vector<16x1xf32>
    %162 = vector.extract_strided_slice %161 {offsets = [0, 0], sizes = [8, 1], strides = [1, 1]} : vector<16x1xf32> to vector<8x1xf32>
    %163 = vector.extract_strided_slice %161 {offsets = [8, 0], sizes = [8, 1], strides = [1, 1]} : vector<16x1xf32> to vector<8x1xf32>
    %cst_65 = arith.constant 0.001953125 : f32
    %164 = vector.broadcast %cst_65 : f32 to vector<8x1xf32>
    %165 = arith.mulf %162, %164 : vector<8x1xf32>
    %cst_66 = arith.constant 0.001953125 : f32
    %166 = vector.broadcast %cst_66 : f32 to vector<8x1xf32>
    %167 = arith.mulf %163, %166 : vector<8x1xf32>
    %168 = arith.mulf %165, %165 : vector<8x1xf32>
    %169 = arith.subf %167, %168 : vector<8x1xf32>
    %cst_67 = arith.constant 9.99999974E-6 : f32
    %170 = vector.broadcast %cst_67 : f32 to vector<8x1xf32>
    %171 = arith.addf %169, %170 : vector<8x1xf32>
    %172 = math.rsqrt %171 : vector<8x1xf32>
    %c0_68 = arith.constant 0 : index
    %c0_69 = arith.constant 0 : index
    %173 = vector.load %arg3[%c0_68, %c0_69] : memref<8x1xf32, #tpu.memory_space<vmem>>, vector<8x1xf32>
    %174 = arith.mulf %172, %173 : vector<8x1xf32>
    %c0_70 = arith.constant 0 : index
    %c0_71 = arith.constant 0 : index
    %175 = vector.load %arg4[%c0_70, %c0_71] : memref<8x1xf32, #tpu.memory_space<vmem>>, vector<8x1xf32>
    %176 = arith.mulf %165, %174 : vector<8x1xf32>
    %177 = arith.subf %175, %176 : vector<8x1xf32>
    %178 = vector.broadcast %174 : vector<8x1xf32> to vector<8x256xf32>
    %179 = arith.mulf %155, %178 : vector<8x256xf32>
    %180 = vector.broadcast %177 : vector<8x1xf32> to vector<8x256xf32>
    %181 = arith.addf %179, %180 : vector<8x256xf32>
    %cst_72 = arith.constant 0.000000e+00 : f32
    %182 = vector.broadcast %cst_72 : f32 to vector<8x256xf32>
    %183 = arith.maximumf %181, %182 : vector<8x256xf32>
    %c17_i32_73 = arith.constant 17 : i32
    %184 = tpu.dynamic_rotate %183 by %c17_i32_73 dim 1 : vector<8x256xf32>, i32 -> vector<8x256xf32>
    %cst_74 = arith.constant 0.000000e+00 : f32
    %185 = vector.broadcast %cst_74 : f32 to vector<8x256xf32>
    %186 = arith.select %22, %184, %185 : vector<8x256xi1>, vector<8x256xf32>
    %c16_i32_75 = arith.constant 16 : i32
    %187 = tpu.dynamic_rotate %183 by %c16_i32_75 dim 1 : vector<8x256xf32>, i32 -> vector<8x256xf32>
    %cst_76 = arith.constant 0.000000e+00 : f32
    %188 = vector.broadcast %cst_76 : f32 to vector<8x256xf32>
    %189 = arith.select %37, %187, %188 : vector<8x256xi1>, vector<8x256xf32>
    %c15_i32_77 = arith.constant 15 : i32
    %190 = tpu.dynamic_rotate %183 by %c15_i32_77 dim 1 : vector<8x256xf32>, i32 -> vector<8x256xf32>
    %cst_78 = arith.constant 0.000000e+00 : f32
    %191 = vector.broadcast %cst_78 : f32 to vector<8x256xf32>
    %192 = arith.select %52, %190, %191 : vector<8x256xi1>, vector<8x256xf32>
    %c1_i32_79 = arith.constant 1 : i32
    %193 = tpu.dynamic_rotate %183 by %c1_i32_79 dim 1 : vector<8x256xf32>, i32 -> vector<8x256xf32>
    %cst_80 = arith.constant 0.000000e+00 : f32
    %194 = vector.broadcast %cst_80 : f32 to vector<8x256xf32>
    %195 = arith.select %67, %193, %194 : vector<8x256xi1>, vector<8x256xf32>
    %c255_i32_81 = arith.constant 255 : i32
    %196 = tpu.dynamic_rotate %183 by %c255_i32_81 dim 1 : vector<8x256xf32>, i32 -> vector<8x256xf32>
    %cst_82 = arith.constant 0.000000e+00 : f32
    %197 = vector.broadcast %cst_82 : f32 to vector<8x256xf32>
    %198 = arith.select %82, %196, %197 : vector<8x256xi1>, vector<8x256xf32>
    %c241_i32_83 = arith.constant 241 : i32
    %199 = tpu.dynamic_rotate %183 by %c241_i32_83 dim 1 : vector<8x256xf32>, i32 -> vector<8x256xf32>
    %cst_84 = arith.constant 0.000000e+00 : f32
    %200 = vector.broadcast %cst_84 : f32 to vector<8x256xf32>
    %201 = arith.select %97, %199, %200 : vector<8x256xi1>, vector<8x256xf32>
    %c240_i32_85 = arith.constant 240 : i32
    %202 = tpu.dynamic_rotate %183 by %c240_i32_85 dim 1 : vector<8x256xf32>, i32 -> vector<8x256xf32>
    %cst_86 = arith.constant 0.000000e+00 : f32
    %203 = vector.broadcast %cst_86 : f32 to vector<8x256xf32>
    %204 = arith.select %112, %202, %203 : vector<8x256xi1>, vector<8x256xf32>
    %c239_i32_87 = arith.constant 239 : i32
    %205 = tpu.dynamic_rotate %183 by %c239_i32_87 dim 1 : vector<8x256xf32>, i32 -> vector<8x256xf32>
    %cst_88 = arith.constant 0.000000e+00 : f32
    %206 = vector.broadcast %cst_88 : f32 to vector<8x256xf32>
    %207 = arith.select %127, %205, %206 : vector<8x256xi1>, vector<8x256xf32>
    %208 = tpu.concatenate %186, %189, %192, %195, %183, %198, %201, %204, %207 in 0 : vector<8x256xf32>, vector<8x256xf32>, vector<8x256xf32>, vector<8x256xf32>, vector<8x256xf32>, vector<8x256xf32>, vector<8x256xf32>, vector<8x256xf32>, vector<8x256xf32> -> vector<72x256xf32>
    %c0_89 = arith.constant 0 : index
    %c0_90 = arith.constant 0 : index
    %209 = vector.load %arg2[%c0_89, %c0_90] : memref<8x72xf32, #tpu.memory_space<vmem>>, vector<8x72xf32>
    %cst_91 = arith.constant dense<0.000000e+00> : vector<8x256xf32>
    %210 = tpu.matmul %209, %208, %cst_91 {dimension_numbers = #tpu.dot_dimension_numbers<[1], [0], [0], [1], [0, 0, 1, 1], [], []>} : vector<8x72xf32>, vector<72x256xf32>, vector<8x256xf32> -> vector<8x256xf32>
    %211 = arith.mulf %210, %210 : vector<8x256xf32>
    %212 = tpu.concatenate %210, %211 in 0 : vector<8x256xf32>, vector<8x256xf32> -> vector<16x256xf32>
    %c0_92 = arith.constant 0 : index
    %c0_93 = arith.constant 0 : index
    %213 = vector.load %arg7[%c0_92, %c0_93] : memref<16x16xf32, #tpu.memory_space<vmem>>, vector<16x16xf32>
    %cst_94 = arith.constant dense<0.000000e+00> : vector<16x256xf32>
    %214 = tpu.matmul %213, %212, %cst_94 {dimension_numbers = #tpu.dot_dimension_numbers<[1], [0], [0], [1], [0, 0, 1, 1], [], []>} : vector<16x16xf32>, vector<16x256xf32>, vector<16x256xf32> -> vector<16x256xf32>
    %cst_95 = arith.constant dense<0.000000e+00> : vector<16xf32>
    %215 = vector.multi_reduction <add>, %214, %cst_95 [1] : vector<16x256xf32> to vector<16xf32>
    %216 = vector.shape_cast %215 : vector<16xf32> to vector<16x1xf32>
    %217 = vector.extract_strided_slice %216 {offsets = [0, 0], sizes = [8, 1], strides = [1, 1]} : vector<16x1xf32> to vector<8x1xf32>
    %218 = vector.extract_strided_slice %216 {offsets = [8, 0], sizes = [8, 1], strides = [1, 1]} : vector<16x1xf32> to vector<8x1xf32>
    %cst_96 = arith.constant 0.001953125 : f32
    %219 = vector.broadcast %cst_96 : f32 to vector<8x1xf32>
    %220 = arith.mulf %217, %219 : vector<8x1xf32>
    %cst_97 = arith.constant 0.001953125 : f32
    %221 = vector.broadcast %cst_97 : f32 to vector<8x1xf32>
    %222 = arith.mulf %218, %221 : vector<8x1xf32>
    %223 = arith.mulf %220, %220 : vector<8x1xf32>
    %224 = arith.subf %222, %223 : vector<8x1xf32>
    %cst_98 = arith.constant 9.99999974E-6 : f32
    %225 = vector.broadcast %cst_98 : f32 to vector<8x1xf32>
    %226 = arith.addf %224, %225 : vector<8x1xf32>
    %227 = math.rsqrt %226 : vector<8x1xf32>
    %c0_99 = arith.constant 0 : index
    %c0_100 = arith.constant 0 : index
    %228 = vector.load %arg5[%c0_99, %c0_100] : memref<8x1xf32, #tpu.memory_space<vmem>>, vector<8x1xf32>
    %229 = arith.mulf %227, %228 : vector<8x1xf32>
    %c0_101 = arith.constant 0 : index
    %c0_102 = arith.constant 0 : index
    %230 = vector.load %arg6[%c0_101, %c0_102] : memref<8x1xf32, #tpu.memory_space<vmem>>, vector<8x1xf32>
    %231 = arith.mulf %220, %229 : vector<8x1xf32>
    %232 = arith.subf %230, %231 : vector<8x1xf32>
    %233 = vector.broadcast %229 : vector<8x1xf32> to vector<8x256xf32>
    %234 = arith.mulf %210, %233 : vector<8x256xf32>
    %235 = vector.broadcast %232 : vector<8x1xf32> to vector<8x256xf32>
    %236 = arith.addf %234, %235 : vector<8x256xf32>
    %237 = arith.addf %236, %128 : vector<8x256xf32>
    %cst_103 = arith.constant 0.000000e+00 : f32
    %238 = vector.broadcast %cst_103 : f32 to vector<8x256xf32>
    %239 = arith.maximumf %237, %238 : vector<8x256xf32>
    %c0_104 = arith.constant 0 : index
    %c0_105 = arith.constant 0 : index
    %240 = vector.load %arg8[%c0_104, %c0_105] : memref<8x256xf32, #tpu.memory_space<vmem>>, vector<8x256xf32>
    tpu.vector_store %arg8[%c0_104, %c0_105], %239 {strides = array<i32>} : memref<8x256xf32, #tpu.memory_space<vmem>>, vector<8x256xf32>,
    return
  }
}

</mosaic_0001>

<bundles_post_ra>
// kernel: tpu_custom_call.1
= control target key start
LH: loop header
LB: loop body
LE: loop exit
PB: predicated region body
PF: predicated region fallthrough
CT: control target
= control target key end

     0   :  { %13 = vsyncpa [#allocation3], 0  ;;  %s1338_s0 = inlined_call_operand.vmem [shape: f32[8,256], index: 0, kind: input, shape index: {}]   ;;  %s1339_s1 = inlined_call_operand.hbm [shape: f32[8,72], index: 1, kind: input, shape index: {}]   ;;  %s1340_s2 = inlined_call_operand.hbm [shape: f32[8,72], index: 2, kind: input, shape index: {}]   ;;  %s1341_s3 = inlined_call_operand.vmem [shape: f32[8,1], index: 3, kind: input, shape index: {}]   ;;  %s1342_s4 = inlined_call_operand.vmem [shape: f32[8,1], index: 4, kind: input, shape index: {}]   ;;  %s1343_s5 = inlined_call_operand.vmem [shape: f32[8,1], index: 5, kind: input, shape index: {}]   ;;  %s1344_s6 = inlined_call_operand.vmem [shape: f32[8,1], index: 6, kind: input, shape index: {}]   ;;  %s1345_s7 = inlined_call_operand.vmem [shape: f32[16,16], index: 7, kind: input, shape index: {}]   ;;  %s1346_s8 = inlined_call_operand.hbm [shape: f32[8,256], index: 8, kind: output, shape index: {}]  }
   0x1   :  { %14 = vsyncpa [#allocation6], 0 }
   0x2   :  { %15 = vsyncpa [#allocation4], 0  ;;  %s807_s27 = smov [#allocation2]   ;;  %s808_s29 = smov [#allocation5]  }
   0x3   :  { %s24_s28 = sshll.u32 %s807_s27, 4  ;;  %s34_s30 = sshll.u32 %s808_s29, 4  ;;  %s25_s28 = int_to_ptr.vmem [resolvable:$true] %s24_s28  ;;  %s35_s30 = int_to_ptr.vmem [resolvable:$true] %s34_s30 }
   0x4   :  { %s749_s9 = scalar_lea.vmem %s25_s28, 128  ;;  %p754_p1 = scmp.lt.s32.totalorder %s25_s28, %s25_s28 }
   0x5   :  { %p750_p0 = scmp.ne.s32.totalorder %s25_s28, %s749_s9  ;;  %p755_p2 = scmp.lt.s32.totalorder %s749_s9, %s749_s9 }
   0x7   :  { %p756_p3 = por %p755_p2, %p754_p1 }
   0x9   :  { %p757_p4 = pnand %p756_p3, %p750_p0 }
   0xb   :  { %760 = shalt.err (!%p757_p4)
}
   0xc   :  { %27 = dma.hbm_to_vmem [thread:$0]  %s1339_s1, 128, %s25_s28, [#allocation3]  }
   0xd   :  { %s769_s12 = scalar_lea.vmem %s35_s30, 128  ;;  %p774_p6 = scmp.lt.s32.totalorder %s35_s30, %s35_s30 }
   0xe   :  { %p770_p5 = scmp.ne.s32.totalorder %s35_s30, %s769_s12  ;;  %p775_p7 = scmp.lt.s32.totalorder %s769_s12, %s769_s12 }
  0x10   :  { %p776_p8 = por %p775_p7, %p774_p6 }
  0x12   :  { %p777_p9 = pnand %p776_p8, %p770_p5 }
  0x14   :  { %780 = shalt.err (!%p777_p9)
}
  0x15   :  { %37 = dma.hbm_to_vmem [thread:$0]  %s1340_s2, 128, %s35_s30, [#allocation6]  }
  0x16   :  { %801 = dma.done.wait [#allocation3], 128  }
  0x17   :  { %802 = vsyncadd [#allocation3], 4294967168 }
  0x18   :  { %803 = dma.done.wait [#allocation6], 128  }
  0x19   :  { %804 = vsyncadd [#allocation6], 4294967168  ;;  %v874_v0 = vld [vmem:[%s1338_s0] sm:$0xff]  ;;  %s809_s1 = smov 112   ;;  %s810_s17 = smov 111   ;;  %v883_v1 = vld [vmem:[%s1338_s0 + $0x8] sm:$0xff]  ;;  %v54_v3 = vlaneseq }
  0x1a   :  { %198 = vrot.lane.b32.xlu1 %v874_v0, %s809_s1  ;;  %207 = vrot.lane.b32.xlu0 %v874_v0, %s810_s17  ;;  %s811_s2 = smov 113   ;;  %s812_s20 = smov 127   ;;  %v814_v2 = vmov 0.0   ;;  %v1382_v26 = vmov 0  ;;  %v1384_v27 = vmov 0  ;;  %v1386_v28 = vmov 0 }
  0x1b   :  { %s813_s0 = smov 1   ;;  %285 = vmatprep.mubr.f32.mxu0 %v814_v2  ;;  %367 = vmatprep.mubr.f32.mxu1 %v814_v2  ;;  %s815_s21 = smov 15   ;;  %v915_v4 = vand.u32 127, %v54_v3  ;;  %v1388_v29 = vmov 0  ;;  %v1409_v49 = vmov 0  ;;  %v1412_v50 = vmov 0 }
  0x1c   :  { %s816_s22 = smov 16   ;;  %s817_s23 = smov 17   ;;  %v1422_v59 = vmov 0  ;;  %v1428_v63 = vmov 0  ;;  %v216_v20 = vld [vmem:[#allocation2] sm:$0xff] }
  0x1d   :  { %v56_v5 = vadd.s32 128, %v915_v4  ;;  %v57_v6 = vcvt.s32.f32 %v915_v4  ;;  %v1222_v25 = vld [vmem:[%s1345_s7] sm:$0xff]  ;;  %s819_s11 = smov [#allocation7]  }
  0x1e   :  { %200 = vrot.lane.b32.xlu1 %v883_v1, %s809_s1  ;;  %209 = vrot.lane.b32.xlu0 %v883_v1, %s810_s17  ;;  %s674_s12 = sshll.u32 %s819_s11, 4  ;;  %s675_s12 = int_to_ptr.vmem [resolvable:$true] %s674_s12 }
  0x1f   :  { %v58_v7 = vcvt.s32.f32 %v56_v5  ;;  %v60_v8 = vmul.f32 0.0625, %v57_v6  ;;  %p786_p11 = scmp.lt.s32.totalorder %s675_s12, %s675_s12 }
  0x21   :  { %v61_v9 = vmul.f32 0.0625, %v58_v7  ;;  %v62_v10 = vfloor.f32 %v60_v8 }
  0x22   :  { %191 = vrot.lane.b32.xlu1 %v883_v1, %s811_s2  ;;  %189 = vrot.lane.b32.xlu0 %v874_v0, %s811_s2 }
  0x23   :  { %v63_v11 = vfloor.f32 %v61_v9  ;;  %v64_v12 = vmul.f32 16.0, %v62_v10  ;;  %v122_v16 = vadd.f32 1.0, %v62_v10  ;;  %vm108_vm11 = vcmp.ge.f32.partialorder %v62_v10, 0.0 }
  0x24   :  { %vm110_vm12 = vcmp.le.f32.partialorder %v62_v10, 15.0  ;;  %v68_v40 = vadd.f32 -1.0, %v62_v10 }
  0x25   :  { %v65_v13 = vmul.f32 16.0, %v63_v11  ;;  %v919_v14 = vsub.f32 %v57_v6, %v64_v12  ;;  %v123_v17 = vadd.f32 1.0, %v63_v11  ;;  %vm124_vm0 = vcmp.ge.f32.partialorder %v122_v16, 0.0 }
  0x26   :  { %182 = vrot.lane.b32.xlu1 %v883_v1, %s812_s20  ;;  %180 = vrot.lane.b32.xlu0 %v874_v0, %s812_s20  ;;  %vm126_vm1 = vcmp.le.f32.partialorder %v122_v16, 15.0  ;;  %v69_v37 = vadd.f32 -1.0, %v63_v11 }
  0x27   :  { %v921_v15 = vsub.f32 %v58_v7, %v65_v13  ;;  %v924_v18 = vadd.f32 1.0, %v919_v14  ;;  %vm125_vm2 = vcmp.ge.f32.partialorder %v123_v17, 0.0  ;;  %vm127_vm3 = vcmp.le.f32.partialorder %v123_v17, 15.0  ;;  %vm931_vm6 = vmand %vm124_vm0, %vm126_vm1 }
  0x28   :  { %vm1347_vm4 = vcmp.ge.f32.partialorder %v919_v14, 0.0  ;;  %vm936_vm8 = vmand %vm125_vm2, %vm127_vm3  ;;  %v963_v24 = vadd.f32 -1.0, %v919_v14 }
  0x29   :  { %v927_v19 = vadd.f32 1.0, %v921_v15  ;;  %vm1348_vm5 = vcmp.ge.f32.partialorder %v924_v18, 0.0  ;;  %vm1350_vm9 = vcmp.ge.f32.partialorder %v921_v15, 0.0  ;;  %vm945_vm10 = vmand %vm931_vm6, %vm1347_vm4  ;;  %vm1351_vm13 = vcmp.le.f32.partialorder %v924_v18, 15.0 }
  0x2a   :  { %173 = vrot.lane.b32.xlu1 %v883_v1, %s813_s0  ;;  %171 = vrot.lane.b32.xlu0 %v874_v0, %s813_s0  ;;  %vm138_vm14 = vmand %vm931_vm6, %vm1348_vm5  ;;  %v955_v23 = vadd.f32 -1.0, %v921_v15  ;;  %vm1353_vm1 = vcmp.le.f32.partialorder %v921_v15, 15.0  ;;  %vm1354_vm5 = vcmp.le.f32.partialorder %v919_v14, 15.0 }
  0x2b   :  { %vm1349_vm7 = vcmp.ge.f32.partialorder %v927_v19, 0.0  ;;  %vm1352_vm15 = vcmp.le.f32.partialorder %v927_v19, 15.0  ;;  %vm135_vm2 = vmand %vm936_vm8, %vm1350_vm9 }
  0x2c   :  { %vm139_vm0 = vmand %vm936_vm8, %vm1349_vm7  ;;  %vm1357_vm9 = vcmp.ge.f32.partialorder %v955_v23, 0.0 }
  0x2d   :  { %vm970_vm3 = vmand %vm108_vm11, %vm110_vm12  ;;  %vm1360_vm12 = vcmp.ge.f32.partialorder %v963_v24, 0.0 }
  0x2e   :  { %164 = vrot.lane.b32.xlu1 %v883_v1, %s815_s21  ;;  %162 = vrot.lane.b32.xlu0 %v874_v0, %s815_s21  ;;  %vm976_vm4 = vmand %vm138_vm14, %vm1351_vm13  ;;  %vm111_vm13 = vcmp.le.f32.partialorder %v63_v11, 15.0 }
  0x2f   :  { %v1383_v26 = vsel %vm976_vm4, 4294967295, %v1382_v26  ;;  %vm983_vm7 = vmand %vm139_vm0, %vm1352_vm15  ;;  %vm109_vm0 = vcmp.ge.f32.partialorder %v63_v11, 0.0  ;;  %vm1361_vm15 = vcmp.le.f32.partialorder %v955_v23, 15.0 }
  0x30   :  { %v1385_v27 = vsel %vm983_vm7, 4294967295, %v1384_v27  ;;  %vm990_vm11 = vmand %vm135_vm2, %vm1353_vm1  ;;  %vm1359_vm1 = vcmp.le.f32.partialorder %v963_v24, 15.0 }
  0x31   :  { %v1387_v28 = vsel %vm990_vm11, 4294967295, %v1386_v28  ;;  %vm999_vm14 = vmand %vm945_vm10, %vm1354_vm5  ;;  %vm1358_vm5 = vcmp.lt.s32.totalorder %v915_v4, 111 }
  0x32   :  { %155 = vrot.lane.b32.xlu1 %v883_v1, %s816_s22  ;;  %153 = vrot.lane.b32.xlu0 %v874_v0, %s816_s22  ;;  %v1389_v29 = vsel %vm999_vm14, 4294967295, %v1388_v29  ;;  %vm131_vm2 = vmand %vm936_vm8, %vm1357_vm9  ;;  %vm1362_vm8 = vcmp.lt.s32.totalorder %v915_v4, 112 }
  0x33   :  { %vm130_vm10 = vmand %vm931_vm6, %vm1360_vm12  ;;  %vm1396_vm6 = vcmp.ge.f32.partialorder %v927_v19, 0.0 }
  0x34   :  { %vm1014_vm14 = vmand %vm109_vm0, %vm111_vm13  ;;  %vm75_vm0 = vcmp.le.f32.partialorder %v69_v37, 15.0 }
  0x35   :  { %vm1020_vm11 = vmand %vm131_vm2, %vm1361_vm15  ;;  %vm1397_vm2 = vcmp.ge.f32.partialorder %v924_v18, 0.0  ;;  %vm73_vm15 = vcmp.ge.f32.partialorder %v69_v37, 0.0 }
  0x36   :  { %146 = vrot.lane.b32.xlu1 %v883_v1, %s817_s23  ;;  %144 = vrot.lane.b32.xlu0 %v874_v0, %s817_s23  ;;  %vm1027_vm9 = vmand %vm130_vm10, %vm1359_vm1  ;;  %vm1402_vm1 = vcmp.le.f32.partialorder %v927_v19, 15.0 }
  0x37   :  { %vm119_vm13 = vmand %vm1014_vm14, %vm1396_vm6 }
  0x38   :  { %vm118_vm10 = vmand %vm970_vm3, %vm1397_vm2  ;;  %vm1401_vm2 = vnez %v1387_v28 }
  0x39   :  { %vm1064_vm12 = vmand %vm119_vm13, %vm1402_vm1  ;;  %vm72_vm1 = vcmp.ge.f32.partialorder %v68_v40, 0.0  ;;  %vm74_vm13 = vcmp.le.f32.partialorder %v68_v40, 15.0 }
  0x8c   :  { %v199_v30 = vpop.permute.xlu1 %198  ;;  %v208_v31 = vpop.permute.xlu0 %207 }
  0x90   :  { %v201_v34 = vpop.permute.xlu1 %200  ;;  %v210_v35 = vpop.permute.xlu0 %209 }
  0x91   :  { %v213_v38 = vsel %vm1358_vm5, %v210_v35, %v208_v31  ;;  %v212_v39 = vsel %vm1358_vm5, %v208_v31, %v210_v35  ;;  %v204_v41 = vsel %vm1362_vm8, %v201_v34, %v199_v30  ;;  %vm1398_vm5 = vcmp.ge.f32.partialorder %v955_v23, 0.0 }
  0x92   :  { %684 = vmatprep.subr.msk.mxu0 %vm983_vm7, %v213_v38  ;;  %vm1054_vm6 = vmand %vm1014_vm14, %vm1398_vm5  ;;  %v203_v43 = vsel %vm1362_vm8, %v199_v30, %v201_v34  ;;  %vm1405_vm5 = vcmp.lt.s32.totalorder %v915_v4, 113  ;;  %vm1407_vm8 = vnez %v1389_v29  ;;  %vm1365_vm7 = vcmp.lt.s32.totalorder %v915_v4, 127  ;;  %v1230_v30 = vld [vmem:[%s1345_s7 + $0x8] sm:$0xff] }
  0x93   :  { %685 = vmatpush1.msk.msra.mxu0 %vm976_vm4, %v212_v39  ;;  %vm1406_vm14 = vmmov %vm1405_vm5  ;;  %v818_v39 = vmov 0  }
  0x94   :  { %v192_v44 = vpop.permute.xlu1 %191  ;;  %686 = vmatprep.subr.msk.mxu0 %vm1401_vm2, %v204_v41  ;;  %v190_v45 = vpop.permute.xlu0 %189  ;;  %vm1408_vm2 = vcmp.le.f32.partialorder %v924_v18, 15.0  ;;  %735 = vset.pattern.permute.xlu0 %v818_v39 }
  0x95   :  { %v194_v47 = vsel %vm1405_vm5, %v190_v45, %v192_v44  ;;  %v195_v48 = vsel %vm1406_vm14, %v192_v44, %v190_v45  ;;  %687 = vmatpush1.msk.msra.mxu0 %vm1407_vm8, %v203_v43  ;;  %vm1076_vm4 = vmand %vm118_vm10, %vm1408_vm2  ;;  %vm1411_vm5 = vcmp.le.f32.partialorder %v955_v23, 15.0  ;;  %736 = vset.pattern.permute.xlu1 %v818_v39  ;;  %v477_v39 = vld [vmem:[#allocation5] sm:$0xff] }
  0x96   :  { %v1410_v49 = vsel %vm1076_vm4, 4294967295, %v1409_v49  ;;  %688 = vmatprep.subr.msk.mxu0 %vm1020_vm11, %v195_v48  ;;  %vm1087_vm14 = vmand %vm1054_vm6, %vm1411_vm5  ;;  %vm1418_vm6 = vcmp.ge.f32.partialorder %v963_v24, 0.0  ;;  %vm1420_vm5 = vcmp.ge.f32.partialorder %v924_v18, 0.0  ;;  %v392_v48 = vld [vmem:[%s1341_s3] sm:$0xff] }
  0x97   :  { %v1413_v50 = vsel %vm1087_vm14, 4294967295, %v1412_v50  ;;  %689 = vmatpush1.msk.msra.mxu0 %vm1027_vm9, %v194_v47  ;;  %vm1093_vm10 = vmand %vm73_vm15, %vm75_vm0  ;;  %vm1367_vm0 = vcmp.lt.s32.totalorder %v915_v4, 1 }
  0x98   :  { %v183_v52 = vpop.permute.xlu1 %182  ;;  %v181_v53 = vpop.permute.xlu0 %180  ;;  %vm1097_vm2 = vmand %vm72_vm1, %vm74_vm13  ;;  %vm1419_vm1 = vcmp.ge.f32.partialorder %v927_v19, 0.0 }
  0x99   :  { %v185_v55 = vsel %vm1365_vm7, %v181_v53, %v183_v52  ;;  %v186_v56 = vsel %vm1365_vm7, %v183_v52, %v181_v53  ;;  %vm114_vm15 = vmand %vm970_vm3, %vm1418_vm6  ;;  %vm1421_vm3 = vcmp.le.f32.partialorder %v963_v24, 15.0  ;;  %v394_v53 = vld [vmem:[%s1342_s4] sm:$0xff] }
  0x9a   :  { %690 = vmatprep.subr.msk.mxu0 %vm1064_vm12, %v186_v56  ;;  %vm101_vm13 = vmand %vm1093_vm10, %vm1419_vm1  ;;  %vm1424_vm1 = vcmp.le.f32.partialorder %v927_v19, 15.0 }
  0x9b   :  { %691 = vmatpush1.msk.msra.mxu0 %vm1076_vm4, %v185_v55  ;;  %vm100_vm7 = vmand %vm1097_vm2, %vm1420_vm5 }
  0x9c   :  { %v174_v57 = vpop.permute.xlu1 %173  ;;  %243 = vmatprep.subr.mxu0 %v883_v1  ;;  %v172_v58 = vpop.permute.xlu0 %171  ;;  %vm1125_vm6 = vmand %vm114_vm15, %vm1421_vm3  ;;  %vm1427_vm3 = vcmp.le.f32.partialorder %v924_v18, 15.0 }
  0x9d   :  { %v1423_v59 = vsel %vm1125_vm6, 4294967295, %v1422_v59  ;;  %v176_v60 = vsel %vm1367_vm0, %v172_v58, %v174_v57  ;;  %v177_v61 = vsel %vm1367_vm0, %v174_v57, %v172_v58  ;;  %244 = vmatpush1.msra.mxu0 %v874_v0  ;;  %vm1136_vm5 = vmand %vm101_vm13, %vm1424_vm1  ;;  %vm1430_vm0 = vcmp.ge.f32.partialorder %v921_v15, 0.0 }
  0x9e   :  { %692 = vmatprep.subr.msk.mxu0 %vm1087_vm14, %v176_v60  ;;  %vm1145_vm4 = vmand %vm100_vm7, %vm1427_vm3  ;;  %vm1431_vm1 = vcmp.ge.f32.partialorder %v919_v14, 0.0  ;;  %vm1432_vm7 = vcmp.lt.s32.totalorder %v915_v4, 15 }
  0x9f   :  { %v1429_v63 = vsel %vm1145_vm4, 4294967295, %v1428_v63  ;;  %693 = vmatpush1.msk.msra.mxu0 %vm1125_vm6, %v177_v61  ;;  %vm91_vm13 = vmand %vm1093_vm10, %vm1430_vm0  ;;  %vm1434_vm0 = vcmp.le.f32.partialorder %v921_v15, 15.0 }
  0xa0   :  { %v165_v3 = vpop.permute.xlu1 %164  ;;  %v163_v5 = vpop.permute.xlu0 %162  ;;  %vm90_vm15 = vmand %vm1097_vm2, %vm1431_vm1  ;;  %vm1437_vm1 = vcmp.le.f32.partialorder %v919_v14, 15.0 }
  0xa1   :  { %v167_v6 = vsel %vm1432_vm7, %v163_v5, %v165_v3  ;;  %vm1433_vm3 = vmmov %vm1432_vm7 }
  0xa2   :  { %v168_v7 = vsel %vm1433_vm3, %v165_v3, %v163_v5  ;;  %694 = vmatprep.subr.msk.mxu0 %vm1136_vm5, %v167_v6  ;;  %vm1168_vm14 = vmand %vm91_vm13, %vm1434_vm0  ;;  %vm1440_vm3 = vcmp.ge.f32.partialorder %v955_v23, 0.0  ;;  %vm1441_vm13 = vcmp.lt.s32.totalorder %v915_v4, 16 }
  0xa3   :  { %695 = vmatpush1.msk.msra.mxu0 %vm1145_vm4, %v168_v7  ;;  %vm1176_vm7 = vmand %vm90_vm15, %vm1437_vm1  ;;  %vm1443_vm4 = vcmp.ge.f32.partialorder %v963_v24, 0.0  ;;  %vm1373_vm1 = vcmp.lt.s32.totalorder %v915_v4, 17 }
  0xa4   :  { %v156_v10 = vpop.permute.xlu1 %155  ;;  %v154_v11 = vpop.permute.xlu0 %153  ;;  %vm81_vm6 = vmand %vm1093_vm10, %vm1440_vm3  ;;  %vm1444_vm10 = vcmp.le.f32.partialorder %v955_v23, 15.0 }
  0xa5   :  { %v158_v12 = vsel %vm1441_vm13, %v154_v11, %v156_v10  ;;  %vm1442_vm0 = vmmov %vm1441_vm13  ;;  %vm1447_vm13 = vcmp.le.f32.partialorder %v963_v24, 15.0 }
  0xa6   :  { %v159_v13 = vsel %vm1442_vm0, %v156_v10, %v154_v11  ;;  %vm80_vm15 = vmand %vm1097_vm2, %vm1443_vm4  ;;  %696 = vmatprep.subr.msk.mxu0 %vm1168_vm14, %v158_v12  ;;  %vm1372_vm4 = vcmask 588800   ;;  %vm1371_vm2 = vcmask 130048  }
  0xa7   :  { %697 = vmatpush1.msk.msra.mxu0 %vm1176_vm7, %v159_v13  ;;  %vm1199_vm3 = vmand %vm81_vm6, %vm1444_vm10  ;;  %vm1450_vm6 = vcmp.lt.s32.totalorder %v915_v4, 111  ;;  %vm1452_vm10 = vnez %v1385_v27 }
  0xa8   :  { %v147_v15 = vpop.permute.xlu1 %146  ;;  %v145_v16 = vpop.permute.xlu0 %144  ;;  %vm1205_vm0 = vmand %vm80_vm15, %vm1447_vm13  ;;  %vm1453_vm13 = vnez %v1383_v26 }
  0xa9   :  { %v149_v18 = vsel %vm1373_vm1, %v145_v16, %v147_v15  ;;  %v150_v19 = vsel %vm1373_vm1, %v147_v15, %v145_v16  ;;  %vm1451_vm15 = vmmov %vm1450_vm6  ;;  %vm1456_vm1 = vnez %v1387_v28 }
  0xaa   :  { %698 = vmatprep.subr.msk.mxu0 %vm1199_vm3, %v149_v18 }
  0xab   :  { %699 = vmatpush1.msk.msra.mxu0 %vm1205_vm0, %v150_v19 }
  0xac   :  { %700 = vmatmul.mubr.msk.f32.vlgmr.msra.gmra.mxu0 %vm1372_vm4, %v216_v20 }
  0xad   :  { %618 = vmatprep.mubr.f32.mxu0 %v814_v2 }
 0x16c   :  { %v287_v21 = vpop.f32.mrf.mxu0 }
 0x16d   :  { %v292_v24 = vmul.f32 %v287_v21, %v287_v21 }
 0x16e   :  { %v289_v22 = vpop.f32.mrf.mxu0 }
 0x16f   :  { %v293_v23 = vmul.f32 %v289_v22, %v289_v22 }
 0x171   :  { %331 = vmatprep.subr.mxu1 %v293_v23 }
 0x172   :  { %332 = vmatpush1.msra.mxu1 %v292_v24 }
 0x173   :  { %333 = vmatprep.subr.mxu1 %v289_v22 }
 0x174   :  { %334 = vmatpush1.msra.mxu1 %v287_v21 }
 0x175   :  { %701 = vmatmul.mubr.msk.f32.vlgmr.msra.gmra.mxu1 %vm1371_vm2, %v1222_v25 }
 0x176   :  { %373 = vmatprep.mubr.f32.mxu1 %v814_v2 }
 0x179   :  { %702 = vmatmul.mubr.msk.f32.gmra.mxu1 %vm1371_vm2, %v1230_v30  ;;  %vm1454_vm2 = vcmp.lt.s32.totalorder %v915_v4, 112 }
 0x17a   :  { %545 = vmatprep.mubr.f32.mxu1 %v814_v2  ;;  %vm1455_vm4 = vmmov %vm1454_vm2 }
 0x235   :  { %v369_v31 = vpop.f32.mrf.mxu1 }
 0x237   :  { %v371_v32 = vpop.f32.mrf.mxu1 }
 0x238   :  { %v380_v34 = vadd.f32 %v371_v32, %v369_v31 }
 0x239   :  { %v375_v35 = vpop.f32.mrf.mxu1 }
 0x23a   :  { %381 = vadd.xlane.f32.xlu0 %v380_v34 }
 0x23b   :  { %v377_v37 = vpop.f32.mrf.mxu1 }
 0x23c   :  { %v383_v38 = vadd.f32 %v377_v37, %v375_v35 }
 0x23e   :  { %384 = vadd.xlane.f32.xlu1 %v383_v38 }
 0x2c3   :  { %v382_v40 = vpop.xlane.xlu0 %381 }
 0x2c4   :  { %v386_v41 = vmul.f32 0.001953125, %v382_v40 }
 0x2c6   :  { %v388_v43 = vmul.f32 %v386_v41, %v386_v41 }
 0x2c7   :  { %v385_v42 = vpop.xlane.xlu1 %384 }
 0x2c8   :  { %v387_v44 = vmul.f32 0.001953125, %v385_v42 }
 0x2ca   :  { %v389_v45 = vsub.f32 %v387_v44, %v388_v43 }
 0x2cc   :  { %v390_v47 = vadd.f32 1e-05, %v389_v45 }
 0x2ce   :  { %737 = vrsqrt.f32 %v390_v47 }
 0x2db   :  { %v738_v51 = vpop.eup %737 }
 0x2dc   :  { %v393_v52 = vmul.f32 %v738_v51, %v392_v48 }
 0x2de   :  { %399 = vperm.xlu0 %735, %v393_v52   ;;  %v395_v54 = vmul.f32 %v393_v52, %v386_v41 }
 0x2e0   :  { %v396_v55 = vsub.f32 %v394_v53, %v395_v54 }
 0x2e2   :  { %406 = vperm.xlu1 %736, %v396_v55   ;;  %v645_v55 = vld [vmem:[%s1344_s6] sm:$0xff] }
 0x359   :  { %v400_v56 = vpop.permute.xlu0 %399 }
 0x35a   :  { %v402_v57 = vmul.f32 %v400_v56, %v287_v21  ;;  %v403_v60 = vmul.f32 %v400_v56, %v289_v22 }
 0x35d   :  { %v407_v58 = vpop.permute.xlu1 %406 }
 0x35e   :  { %v409_v61 = vadd.f32 %v407_v58, %v402_v57  ;;  %v410_v3 = vadd.f32 %v407_v58, %v403_v60 }
 0x360   :  { %v411_v5 = vmax.f32 %v409_v61, 0.0  ;;  %v412_v6 = vmax.f32 %v410_v3, 0.0 }
 0x362   :  { %445 = vrot.lane.b32.xlu0 %v411_v5, %s812_s20  ;;  %469 = vrot.lane.b32.xlu1 %v411_v5, %s810_s17 }
 0x366   :  { %437 = vrot.lane.b32.xlu0 %v411_v5, %s813_s0  ;;  %471 = vrot.lane.b32.xlu1 %v412_v6, %s810_s17 }
 0x36a   :  { %429 = vrot.lane.b32.xlu0 %v411_v5, %s815_s21  ;;  %461 = vrot.lane.b32.xlu1 %v411_v5, %s809_s1 }
 0x36e   :  { %421 = vrot.lane.b32.xlu0 %v411_v5, %s816_s22  ;;  %463 = vrot.lane.b32.xlu1 %v412_v6, %s809_s1 }
 0x372   :  { %413 = vrot.lane.b32.xlu0 %v411_v5, %s817_s23  ;;  %453 = vrot.lane.b32.xlu1 %v411_v5, %s811_s2 }
 0x376   :  { %455 = vrot.lane.b32.xlu1 %v412_v6, %s811_s2 }
 0x37a   :  { %447 = vrot.lane.b32.xlu1 %v412_v6, %s812_s20 }
 0x37e   :  { %439 = vrot.lane.b32.xlu1 %v412_v6, %s813_s0 }
 0x382   :  { %431 = vrot.lane.b32.xlu1 %v412_v6, %s815_s21 }
 0x386   :  { %423 = vrot.lane.b32.xlu1 %v412_v6, %s816_s22 }
 0x38a   :  { %415 = vrot.lane.b32.xlu1 %v412_v6, %s817_s23 }
 0x3d4   :  { %v470_v7 = vpop.permute.xlu1 %469  ;;  %v446_v19 = vpop.permute.xlu0 %445 }
 0x3d8   :  { %v472_v10 = vpop.permute.xlu1 %471  ;;  %v438_v22 = vpop.permute.xlu0 %437 }
 0x3d9   :  { %v473_v11 = vsel %vm1450_vm6, %v470_v7, %v472_v10  ;;  %v474_v12 = vsel %vm1451_vm15, %v472_v10, %v470_v7  ;;  %vm1457_vm6 = vcmp.lt.s32.totalorder %v915_v4, 113 }
 0x3da   :  { %703 = vmatprep.subr.msk.mxu1 %vm1452_vm10, %v474_v12  ;;  %vm1458_vm15 = vmmov %vm1457_vm6  ;;  %vm1465_vm10 = vnez %v1423_v59 }
 0x3db   :  { %704 = vmatpush1.msk.msra.mxu1 %vm1453_vm13, %v473_v11 }
 0x3dc   :  { %v462_v13 = vpop.permute.xlu1 %461  ;;  %v430_v24 = vpop.permute.xlu0 %429 }
 0x3e0   :  { %v464_v15 = vpop.permute.xlu1 %463  ;;  %v422_v34 = vpop.permute.xlu0 %421 }
 0x3e1   :  { %v465_v16 = vsel %vm1454_vm2, %v462_v13, %v464_v15  ;;  %v466_v18 = vsel %vm1455_vm4, %v464_v15, %v462_v13  ;;  %vm1461_vm4 = vnez %v1410_v49  ;;  %vm1464_vm2 = vnez %v1413_v50 }
 0x3e2   :  { %705 = vmatprep.subr.msk.mxu1 %vm1456_vm1, %v466_v18  ;;  %vm1459_vm1 = vcmp.lt.s32.totalorder %v915_v4, 127 }
 0x3e3   :  { %706 = vmatpush1.msk.msra.mxu1 %vm1407_vm8, %v465_v16  ;;  %vm1460_vm8 = vmmov %vm1459_vm1 }
 0x3e4   :  { %v454_v27 = vpop.permute.xlu1 %453  ;;  %v414_v37 = vpop.permute.xlu0 %413 }
 0x3e8   :  { %v456_v20 = vpop.permute.xlu1 %455 }
 0x3e9   :  { %v457_v26 = vsel %vm1457_vm6, %v454_v27, %v456_v20  ;;  %v458_v21 = vsel %vm1458_vm15, %v456_v20, %v454_v27  ;;  %vm1468_vm6 = vnez %v1429_v63  ;;  %vm1469_vm15 = vcmp.lt.s32.totalorder %v915_v4, 16 }
 0x3ea   :  { %707 = vmatprep.subr.msk.mxu1 %vm1020_vm11, %v458_v21  ;;  %vm1462_vm11 = vcmp.lt.s32.totalorder %v915_v4, 1 }
 0x3eb   :  { %708 = vmatpush1.msk.msra.mxu1 %vm1027_vm9, %v457_v26  ;;  %vm1463_vm9 = vmmov %vm1462_vm11 }
 0x3ec   :  { %v448_v28 = vpop.permute.xlu1 %447 }
 0x3ed   :  { %v449_v29 = vsel %vm1459_vm1, %v446_v19, %v448_v28  ;;  %v450_v23 = vsel %vm1460_vm8, %v448_v28, %v446_v19  ;;  %vm1470_vm1 = vmmov %vm1469_vm15 }
 0x3ee   :  { %709 = vmatprep.subr.msk.mxu1 %vm1064_vm12, %v450_v23  ;;  %vm1466_vm12 = vcmp.lt.s32.totalorder %v915_v4, 15 }
 0x3ef   :  { %710 = vmatpush1.msk.msra.mxu1 %vm1461_vm4, %v449_v29  ;;  %vm1467_vm13 = vmmov %vm1466_vm12  ;;  %vm1473_vm4 = vcmask 588800  }
 0x3f0   :  { %503 = vmatprep.subr.mxu1 %v412_v6  ;;  %v440_v33 = vpop.permute.xlu1 %439 }
 0x3f1   :  { %v441_v36 = vsel %vm1462_vm11, %v438_v22, %v440_v33  ;;  %v442_v31 = vsel %vm1463_vm9, %v440_v33, %v438_v22  ;;  %504 = vmatpush1.msra.mxu1 %v411_v5 }
 0x3f2   :  { %711 = vmatprep.subr.msk.mxu1 %vm1464_vm2, %v441_v36 }
 0x3f3   :  { %712 = vmatpush1.msk.msra.mxu1 %vm1465_vm10, %v442_v31 }
 0x3f4   :  { %v432_v46 = vpop.permute.xlu1 %431 }
 0x3f5   :  { %v433_v49 = vsel %vm1466_vm12, %v430_v24, %v432_v46  ;;  %v434_v32 = vsel %vm1467_vm13, %v432_v46, %v430_v24 }
 0x3f6   :  { %713 = vmatprep.subr.msk.mxu1 %vm1136_vm5, %v433_v49  ;;  %vm1471_vm5 = vcmp.lt.s32.totalorder %v915_v4, 17 }
 0x3f7   :  { %714 = vmatpush1.msk.msra.mxu1 %vm1468_vm6, %v434_v32  ;;  %vm1472_vm8 = vmmov %vm1471_vm5 }
 0x3f8   :  { %v424_v35 = vpop.permute.xlu1 %423 }
 0x3f9   :  { %v425_v50 = vsel %vm1469_vm15, %v422_v34, %v424_v35  ;;  %v426_v59 = vsel %vm1470_vm1, %v424_v35, %v422_v34 }
 0x3fa   :  { %715 = vmatprep.subr.msk.mxu1 %vm1168_vm14, %v425_v50  ;;  %vm1474_vm14 = vcmask 130048  }
 0x3fb   :  { %716 = vmatpush1.msk.msra.mxu1 %vm1176_vm7, %v426_v59  ;;  %vm1475_vm7 = vmmov %vm1474_vm14 }
 0x3fc   :  { %v416_v38 = vpop.permute.xlu1 %415 }
 0x3fd   :  { %v417_v62 = vsel %vm1471_vm5, %v414_v37, %v416_v38  ;;  %v418_v63 = vsel %vm1472_vm8, %v416_v38, %v414_v37 }
 0x3fe   :  { %717 = vmatprep.subr.msk.mxu1 %vm1199_vm3, %v417_v62 }
 0x3ff   :  { %718 = vmatpush1.msk.msra.mxu1 %vm1205_vm0, %v418_v63 }
 0x400   :  { %719 = vmatmul.mubr.msk.f32.vlgmr.msra.gmra.mxu1 %vm1473_vm4, %v477_v39 }
 0x4c0   :  { %v547_v8 = vpop.f32.mrf.mxu1 }
 0x4c1   :  { %v552_v41 = vmul.f32 %v547_v8, %v547_v8 }
 0x4c2   :  { %v549_v9 = vpop.f32.mrf.mxu1 }
 0x4c3   :  { %v553_v40 = vmul.f32 %v549_v9, %v549_v9 }
 0x4c5   :  { %582 = vmatprep.subr.mxu0 %v553_v40 }
 0x4c6   :  { %583 = vmatpush1.msra.mxu0 %v552_v41 }
 0x4c7   :  { %584 = vmatprep.subr.mxu0 %v549_v9 }
 0x4c8   :  { %585 = vmatpush1.msra.mxu0 %v547_v8 }
 0x4c9   :  { %720 = vmatmul.mubr.msk.f32.vlgmr.msra.gmra.mxu0 %vm1474_vm14, %v1222_v25 }
 0x4ca   :  { %624 = vmatprep.mubr.f32.mxu0 %v814_v2  ;;  %v643_v2 = vld [vmem:[%s1343_s5] sm:$0xff]  ;;  %s781_s5 = scalar_lea.vmem %s675_s12, 256 }
 0x4cb   :  { %p782_p10 = scmp.ne.s32.totalorder %s675_s12, %s781_s5  ;;  %p787_p12 = scmp.lt.s32.totalorder %s781_s5, %s781_s5 }
 0x4cd   :  { %721 = vmatmul.mubr.msk.f32.gmra.mxu0 %vm1475_vm7, %v1230_v30  ;;  %p788_p13 = por %p787_p12, %p786_p11 }
 0x4cf   :  { %p789_p0 = pnand %p788_p13, %p782_p10 }
 0x589   :  { %v620_v4 = vpop.f32.mrf.mxu0 }
 0x58b   :  { %v622_v14 = vpop.f32.mrf.mxu0 }
 0x58c   :  { %v631_v17 = vadd.f32 %v622_v14, %v620_v4 }
 0x58d   :  { %v626_v42 = vpop.f32.mrf.mxu0 }
 0x58e   :  { %632 = vadd.xlane.f32.xlu0 %v631_v17 }
 0x58f   :  { %v628_v43 = vpop.f32.mrf.mxu0 }
 0x590   :  { %v634_v44 = vadd.f32 %v628_v43, %v626_v42 }
 0x592   :  { %635 = vadd.xlane.f32.xlu1 %v634_v44 }
 0x617   :  { %v633_v45 = vpop.xlane.xlu0 %632 }
 0x618   :  { %v637_v47 = vmul.f32 0.001953125, %v633_v45 }
 0x61a   :  { %v639_v51 = vmul.f32 %v637_v47, %v637_v47 }
 0x61b   :  { %v636_v48 = vpop.xlane.xlu1 %635 }
 0x61c   :  { %v638_v52 = vmul.f32 0.001953125, %v636_v48 }
 0x61e   :  { %v640_v53 = vsub.f32 %v638_v52, %v639_v51 }
 0x620   :  { %v641_v25 = vadd.f32 1e-05, %v640_v53 }
 0x622   :  { %739 = vrsqrt.f32 %v641_v25 }
 0x62f   :  { %v740_v30 = vpop.eup %739 }
 0x630   :  { %v644_v54 = vmul.f32 %v740_v30, %v643_v2 }
 0x632   :  { %650 = vperm.xlu0 %735, %v644_v54   ;;  %v646_v56 = vmul.f32 %v644_v54, %v637_v47 }
 0x634   :  { %v647_v57 = vsub.f32 %v645_v55, %v646_v56 }
 0x636   :  { %657 = vperm.xlu1 %736, %v647_v57  }
 0x6ad   :  { %v651_v58 = vpop.permute.xlu0 %650 }
 0x6ae   :  { %v653_v60 = vmul.f32 %v651_v58, %v547_v8  ;;  %v654_v61 = vmul.f32 %v651_v58, %v549_v9 }
 0x6b1   :  { %v658_v3 = vpop.permute.xlu1 %657 }
 0x6b2   :  { %v660_v5 = vadd.f32 %v658_v3, %v653_v60  ;;  %v661_v6 = vadd.f32 %v658_v3, %v654_v61 }
 0x6b4   :  { %v662_v7 = vadd.f32 %v660_v5, %v874_v0  ;;  %v663_v10 = vadd.f32 %v661_v6, %v883_v1 }
 0x6b6   :  { %v664_v11 = vmax.f32 %v662_v7, 0.0  ;;  %v665_v12 = vmax.f32 %v663_v10, 0.0 }
 0x6b8   :  { %666 = vst [vmem:[#allocation7] sm:$0xff] %v664_v11  ;;  %667 = vst [vmem:[#allocation7 + $0x8] sm:$0xff] %v665_v12 }
 0x6b9   :  { %792 = shalt.err (!%p789_p0)
}
 0x6ba   :  { %677 = dma.vmem_to_hbm [thread:$0]  %s675_s12, 256, %s1346_s8, [#allocation4]  }
 0x6bb   :  { %805 = dma.done.wait [#allocation4], 256  }
 0x6bc   :  { %806 = vsyncadd [#allocation4], 4294967040 }
 0x6bd   :  { %681 = vsyncpa [#allocation3], 1 }
 0x6be   :  { %682 = vsyncpa [#allocation6], 1 }
 0x6bf   :  { %683 = vsyncpa [#allocation4], 1 }

</bundles_post_ra>
